<compile_context>
chip_gen: v7x
topology: tpu7x:2x2x1
jax: 0.10.0
libtpu: 0.0.40
codegen_flags: <defaults>
</compile_context>

<pallas_src>
import functools
import math

import jax
import jax.numpy as jnp
from jax.experimental import pallas as pl
from jax.experimental.pallas import tpu as pltpu

# ----------------------------- model sizes ---------------------------------
LATENT_SPACE_DIM = 16          # L
HIDDEN_DIM = 64                # hidden width of encoder / decoder MLPs
B, C, H, W = 2, 4, 16, 16      # small synthetic input (NCHW)
D_IN = C * H * W               # 1024 flattened features
ENC_W = 128                    # lane-dense (padded) encoder-output width >= 2*L

ROW_Q = 16                     # batch-row quantum (bf16 sublane pack factor)


def _round_up(x, m):
    return (x + m - 1) // m * m


# ------------------------------ kernel --------------------------------------
def _modvae_kernel(training, latent_dim, *refs):
    """Full ModVAE forward on one batch tile, entirely in VMEM."""
    if training:
        (x_ref, zeta_ref,
         we1_ref, be1_ref, we2_ref, be2_ref,
         wd1_ref, bd1_ref, wd2_ref, bd2_ref,
         dec_ref, enc_ref) = refs
    else:
        (x_ref,
         we1_ref, be1_ref, we2_ref, be2_ref,
         wd1_ref, bd1_ref, wd2_ref, bd2_ref,
         dec_ref, enc_ref) = refs
        zeta_ref = None

    # ---- DenseEncoderVAE: fc -> relu -> fc (lane-dense [TM, ENC_W]) ----
    x = x_ref[...]                                            # bf16 [TM, D_IN]
    h1 = jnp.dot(x, we1_ref[...], preferred_element_type=jnp.float32)
    h1 = jnp.maximum(h1 + be1_ref[...], 0.0)                  # [TM, HIDDEN] f32
    enc = jnp.dot(h1, we2_ref[...], preferred_element_type=jnp.float32)
    enc = enc + be2_ref[...]                                  # [TM, ENC_W] f32

    # Single unmasked, lane-dense store; mu/logvar split happens in the wrapper.
    enc_ref[...] = enc

    L = latent_dim
    # encoder_out.view(-1, 2, L): first L columns = mu, next L = logvar.
    mu = enc[:, :L]
    logvar = enc[:, L:2 * L]

    if training:
        # reparameterization: z = zeta * exp(0.5 * logvar) + mu
        std = jnp.exp(0.5 * logvar)
        z = zeta_ref[...] * std + mu
    else:
        z = mu                                                # eval path

    # ---- DecoderVAE: fc -> relu -> fc -> sigmoid (reconstruct D_IN) ----
    d1 = jnp.dot(z, wd1_ref[...], preferred_element_type=jnp.float32)
    d1 = jnp.maximum(d1 + bd1_ref[...], 0.0)                  # [TM, HIDDEN]
    d2 = jnp.dot(d1.astype(jnp.bfloat16), wd2_ref[...],
                 preferred_element_type=jnp.float32)
    d2 = d2 + bd2_ref[...]                                    # [TM, D_IN]
    # sigmoid(x) == 0.5*(tanh(x/2)+1): one EUP op/elem instead of exp+recip.
    dec_ref[...] = 0.5 * (jnp.tanh(0.5 * d2) + 1.0)


# ------------------------------ wrapper --------------------------------------
def modvae_forward(x_nchw, params, *, training=False, rng=None, tm=256):
    """Runs the ModVAE forward pass. Returns (decoder_out, mu, logvar)."""
    b = x_nchw.shape[0]
    # bf16 activation I/O: halves the dominant x DMA; accumulation stays f32.
    x_flat = x_nchw.reshape(b, -1).astype(jnp.bfloat16)       # [B, D_IN] bf16
    d_in = x_flat.shape[1]
    L = LATENT_SPACE_DIM

    # ---- batch tiling (16-row quantum so bf16 tiles are always legal) ----
    tm = max(ROW_Q, (tm // ROW_Q) * ROW_Q)
    b_q = _round_up(b, ROW_Q)
    tile_m = min(tm, b_q)
    # v7x megacore: guarantee >= 2 grid steps whenever the batch allows, so
    # dimension_semantics=("parallel",) shards across both TensorCores.
    if b_q >= 2 * ROW_Q:
        tile_m = min(tile_m, max(ROW_Q, (b_q // 2) // ROW_Q * ROW_Q))
    b_pad = _round_up(b_q, tile_m)
    if b_pad != b:
        x_flat = jnp.pad(x_flat, ((0, b_pad - b), (0, 0)))
    grid = (b_pad // tile_m,)

    # ---- weights: bf16 compression of the two big matrices; we2/be2 padded
    #      to ENC_W lanes so the encoder output is fully lane-dense. ----
    we1 = params["we1"].astype(jnp.bfloat16)                  # [D_IN, HID] bf16
    wd2 = params["wd2"].astype(jnp.bfloat16)                  # [HID, D_IN] bf16
    we2 = jnp.pad(params["we2"], ((0, 0), (0, ENC_W - 2 * L)))  # [HID, ENC_W]
    be2 = jnp.pad(params["be2"], ((0, 0), (0, ENC_W - 2 * L)))  # [1, ENC_W]
    be1, wd1 = params["be1"], params["wd1"]
    bd1, bd2 = params["bd1"], params["bd2"]
    weights = [we1, be1, we2, be2, wd1, bd1, wd2, bd2]

    def row_spec(width):
        return pl.BlockSpec((tile_m, width), lambda i: (i, 0))

    def resident_spec(arr):
        # Constant index_map -> weight tile stays VMEM-resident across steps.
        # TODO(synk): pipeline_mode=pl.Buffered(1) would drop the dead second
        # weight buffer; the VMEM budget below conservatively counts 2 copies.
        return pl.BlockSpec(arr.shape, lambda i: (0, 0))

    inputs = [x_flat]
    in_specs = [row_spec(d_in)]
    if training:
        assert rng is not None, "training=True requires an rng key for zeta"
        # TODO(synk): generate zeta in-kernel (pltpu.prng_seed + stateful_normal)
        # to drop this input; kept host-side so the training path is exactly
        # reproducible against the jax.random reference below.
        zeta = jax.random.normal(rng, (b, L), dtype=jnp.float32)
        if b_pad != b:
            zeta = jnp.pad(zeta, ((0, b_pad - b), (0, 0)))
        inputs.append(zeta)
        in_specs.append(row_spec(L))
    inputs += weights
    in_specs += [resident_spec(w) for w in weights]

    out_shapes = (
        jax.ShapeDtypeStruct((b_pad, d_in), jnp.float32),      # decoder_out
        jax.ShapeDtypeStruct((b_pad, ENC_W), jnp.float32),     # [mu | logvar | 0]
    )
    out_specs = (row_spec(d_in), row_spec(ENC_W))

    # ---- VMEM budget from the real footprint: double-buffered batch tiles
    #      + (double-buffered) weights + compiler-scratch headroom; capped
    #      well under v7x's 64 MiB physical VMEM. ----
    tile_bytes = tile_m * (d_in * 2 + d_in * 4 + ENC_W * 4)   # x + dec + enc
    if training:
        tile_bytes += tile_m * L * 4                          # zeta
    weight_bytes = sum(int(w.size) * w.dtype.itemsize for w in weights)
    vmem_bytes = int(min(2 * tile_bytes + 2 * weight_bytes + (4 << 20),
                         48 << 20))

    flops = 2 * b_pad * (d_in * HIDDEN_DIM + HIDDEN_DIM * ENC_W
                         + L * HIDDEN_DIM + HIDDEN_DIM * d_in)
    transcendentals = b_pad * (d_in + (L if training else 0))  # tanh (+ exp)
    bytes_accessed = (sum(int(a.size) * a.dtype.itemsize for a in inputs)
                      + sum(math.prod(s.shape) * 4 for s in out_shapes))

    dec_pad, enc_pad = pl.pallas_call(
        functools.partial(_modvae_kernel, training, L),
        out_shape=out_shapes,
        grid=grid,
        in_specs=in_specs,
        out_specs=out_specs,
        compiler_params=pltpu.CompilerParams(
            dimension_semantics=("parallel",),                 # v7x: both TCs
            vmem_limit_bytes=vmem_bytes,
        ),
        cost_estimate=pl.CostEstimate(
            flops=flops,
            transcendentals=transcendentals,
            bytes_accessed=bytes_accessed,
        ),
    )(*inputs)

    dec_out = dec_pad[:b]
    mu = enc_pad[:b, :L]
    logvar = enc_pad[:b, L:2 * L]
    return dec_out, mu, logvar


# -------------------------- deterministic params -----------------------------
def init_params(key):
    ks = jax.random.split(key, 8)

    def lin(k, fan_in, fan_out):
        scale = 1.0 / jnp.sqrt(jnp.float32(fan_in))
        w = jax.random.uniform(k, (fan_in, fan_out), jnp.float32, -scale, scale)
        b = jnp.zeros((1, fan_out), jnp.float32)
        return w, b

    we1, be1 = lin(ks[0], D_IN, HIDDEN_DIM)
    we2, be2 = lin(ks[1], HIDDEN_DIM, 2 * LATENT_SPACE_DIM)
    wd1, bd1 = lin(ks[2], LATENT_SPACE_DIM, HIDDEN_DIM)
    wd2, bd2 = lin(ks[3], HIDDEN_DIM, D_IN)
    return dict(we1=we1, be1=be1, we2=we2, be2=be2,
                wd1=wd1, bd1=bd1, wd2=wd2, bd2=bd2)


if __name__ == "__main__":
    key = jax.random.PRNGKey(0)
    k_x, k_p, k_z = jax.random.split(key, 3)

    x = jax.random.normal(k_x, (B, C, H, W), dtype=jnp.float32)   # NCHW
    params = init_params(k_p)
    L = LATENT_SPACE_DIM

    # eval path (self.training == False): sampled_latent = mu
    dec_out, mu, logvar = modvae_forward(x, params, training=False)
    jax.block_until_ready((dec_out, mu, logvar))

    # training path: z = mu + zeta * exp(0.5 * logvar), zeta ~ N(0, 1)
    dec_tr, mu_tr, logvar_tr = modvae_forward(x, params, training=True, rng=k_z)
    jax.block_until_ready((dec_tr, mu_tr, logvar_tr))

    assert dec_out.shape == (B, D_IN)
    assert mu.shape == (B, L)
    assert logvar.shape == (B, L)
    assert dec_tr.shape == (B, D_IN)

    # ---- pure-JAX reference mirroring the bf16 activation/weight compression ----
    xf_bf = x.reshape(B, -1).astype(jnp.bfloat16)
    we1_bf = params["we1"].astype(jnp.bfloat16)
    wd2_bf = params["wd2"].astype(jnp.bfloat16)

    h = jnp.maximum(
        jnp.dot(xf_bf, we1_bf,
                preferred_element_type=jnp.float32) + params["be1"], 0.0)
    enc = jnp.dot(h, params["we2"],
                  preferred_element_type=jnp.float32) + params["be2"]
    mu_ref, lv_ref = enc[:, :L], enc[:, L:]

    def decode(z):
        d = jnp.maximum(
            jnp.dot(z, params["wd1"],
                    preferred_element_type=jnp.float32) + params["bd1"], 0.0)
        return jax.nn.sigmoid(
            jnp.dot(d.astype(jnp.bfloat16), wd2_bf,
                    preferred_element_type=jnp.float32) + params["bd2"])

    # eval path
    dec_ref = decode(mu_ref)
    assert jnp.allclose(mu, mu_ref, atol=1e-3)
    assert jnp.allclose(logvar, lv_ref, atol=1e-3)
    assert jnp.allclose(dec_out, dec_ref, atol=1e-3)

    # training path (encoder stats must match eval; zeta regenerated identically)
    zeta = jax.random.normal(k_z, (B, L), dtype=jnp.float32)
    z_tr = zeta * jnp.exp(0.5 * lv_ref) + mu_ref
    dec_tr_ref = decode(z_tr)
    assert jnp.allclose(mu_tr, mu_ref, atol=1e-3)
    assert jnp.allclose(logvar_tr, lv_ref, atol=1e-3)
    assert jnp.allclose(dec_tr, dec_tr_ref, atol=1e-3)

    print("KERNEL_OK")
</pallas_src>

<mosaic_0001>
module attributes {stable_mosaic.version = 11 : i64} {
  func.func @_modvae_kernel(%arg0: i32, %arg1: memref<16x1024xbf16, #tpu.memory_space<vmem>>, %arg2: memref<1024x64xbf16, #tpu.memory_space<vmem>>, %arg3: memref<1x64xf32, #tpu.memory_space<vmem>>, %arg4: memref<64x128xf32, #tpu.memory_space<vmem>>, %arg5: memref<1x128xf32, #tpu.memory_space<vmem>>, %arg6: memref<16x64xf32, #tpu.memory_space<vmem>>, %arg7: memref<1x64xf32, #tpu.memory_space<vmem>>, %arg8: memref<64x1024xbf16, #tpu.memory_space<vmem>>, %arg9: memref<1x1024xf32, #tpu.memory_space<vmem>>, %arg10: memref<16x1024xf32, #tpu.memory_space<vmem>>, %arg11: memref<16x128xf32, #tpu.memory_space<vmem>>) attributes {dimension_semantics = [#tpu.dimension_semantics<parallel>], iteration_bounds = array<i64: 1>, scalar_prefetch = 0 : i64, scratch_operands = 0 : i64, tpu.core_type = #tpu.core_type<tc>, window_params = [{transform_indices = @transform_0, window_bounds = array<i64: 16, 1024>}, {pipeline_mode = #tpu.pipeline_mode<synchronous>, transform_indices = @transform_1, window_bounds = array<i64: 1024, 64>}, {pipeline_mode = #tpu.pipeline_mode<synchronous>, transform_indices = @transform_2, window_bounds = array<i64: 1, 64>}, {pipeline_mode = #tpu.pipeline_mode<synchronous>, transform_indices = @transform_3, window_bounds = array<i64: 64, 128>}, {pipeline_mode = #tpu.pipeline_mode<synchronous>, transform_indices = @transform_4, window_bounds = array<i64: 1, 128>}, {pipeline_mode = #tpu.pipeline_mode<synchronous>, transform_indices = @transform_5, window_bounds = array<i64: 16, 64>}, {pipeline_mode = #tpu.pipeline_mode<synchronous>, transform_indices = @transform_6, window_bounds = array<i64: 1, 64>}, {pipeline_mode = #tpu.pipeline_mode<synchronous>, transform_indices = @transform_7, window_bounds = array<i64: 64, 1024>}, {pipeline_mode = #tpu.pipeline_mode<synchronous>, transform_indices = @transform_8, window_bounds = array<i64: 1, 1024>}, {transform_indices = @transform_9, window_bounds = array<i64: 16, 1024>}, {transform_indices = @transform_10, window_bounds = array<i64: 16, 128>}]} {
    %c0 = arith.constant 0 : index
    %c0_0 = arith.constant 0 : index
    %0 = vector.load %arg1[%c0, %c0_0] : memref<16x1024xbf16, #tpu.memory_space<vmem>>, vector<16x1024xbf16>
    %c0_1 = arith.constant 0 : index
    %c0_2 = arith.constant 0 : index
    %1 = vector.load %arg2[%c0_1, %c0_2] : memref<1024x64xbf16, #tpu.memory_space<vmem>>, vector<1024x64xbf16>
    %cst = arith.constant dense<0.000000e+00> : vector<16x64xf32>
    %2 = tpu.matmul %0, %1, %cst {dimension_numbers = #tpu.dot_dimension_numbers<[1], [0], [0], [1], [0, 0, 1, 1], [], []>} : vector<16x1024xbf16>, vector<1024x64xbf16>, vector<16x64xf32> -> vector<16x64xf32>
    %c0_3 = arith.constant 0 : index
    %c0_4 = arith.constant 0 : index
    %3 = vector.load %arg3[%c0_3, %c0_4] : memref<1x64xf32, #tpu.memory_space<vmem>>, vector<1x64xf32>
    %4 = vector.broadcast %3 : vector<1x64xf32> to vector<16x64xf32>
    %5 = arith.addf %2, %4 : vector<16x64xf32>
    %cst_5 = arith.constant 0.000000e+00 : f32
    %6 = vector.broadcast %cst_5 : f32 to vector<16x64xf32>
    %7 = arith.maximumf %5, %6 : vector<16x64xf32>
    %c0_6 = arith.constant 0 : index
    %c0_7 = arith.constant 0 : index
    %8 = vector.load %arg4[%c0_6, %c0_7] : memref<64x128xf32, #tpu.memory_space<vmem>>, vector<64x128xf32>
    %cst_8 = arith.constant dense<0.000000e+00> : vector<16x128xf32>
    %9 = tpu.matmul %7, %8, %cst_8 {dimension_numbers = #tpu.dot_dimension_numbers<[1], [0], [0], [1], [0, 0, 1, 1], [], []>} : vector<16x64xf32>, vector<64x128xf32>, vector<16x128xf32> -> vector<16x128xf32>
    %c0_9 = arith.constant 0 : index
    %c0_10 = arith.constant 0 : index
    %10 = vector.load %arg5[%c0_9, %c0_10] : memref<1x128xf32, #tpu.memory_space<vmem>>, vector<1x128xf32>
    %11 = vector.broadcast %10 : vector<1x128xf32> to vector<16x128xf32>
    %12 = arith.addf %9, %11 : vector<16x128xf32>
    %c0_11 = arith.constant 0 : index
    %c0_12 = arith.constant 0 : index
    %13 = vector.load %arg11[%c0_11, %c0_12] : memref<16x128xf32, #tpu.memory_space<vmem>>, vector<16x128xf32>
    tpu.vector_store %arg11[%c0_11, %c0_12], %12 {strides = array<i32>} : memref<16x128xf32, #tpu.memory_space<vmem>>, vector<16x128xf32>,
    %14 = vector.extract_strided_slice %12 {offsets = [0, 0], sizes = [16, 16], strides = [1, 1]} : vector<16x128xf32> to vector<16x16xf32>
    %c0_13 = arith.constant 0 : index
    %c0_14 = arith.constant 0 : index
    %15 = vector.load %arg6[%c0_13, %c0_14] : memref<16x64xf32, #tpu.memory_space<vmem>>, vector<16x64xf32>
    %cst_15 = arith.constant dense<0.000000e+00> : vector<16x64xf32>
    %16 = tpu.matmul %14, %15, %cst_15 {dimension_numbers = #tpu.dot_dimension_numbers<[1], [0], [0], [1], [0, 0, 1, 1], [], []>} : vector<16x16xf32>, vector<16x64xf32>, vector<16x64xf32> -> vector<16x64xf32>
    %c0_16 = arith.constant 0 : index
    %c0_17 = arith.constant 0 : index
    %17 = vector.load %arg7[%c0_16, %c0_17] : memref<1x64xf32, #tpu.memory_space<vmem>>, vector<1x64xf32>
    %18 = vector.broadcast %17 : vector<1x64xf32> to vector<16x64xf32>
    %19 = arith.addf %16, %18 : vector<16x64xf32>
    %cst_18 = arith.constant 0.000000e+00 : f32
    %20 = vector.broadcast %cst_18 : f32 to vector<16x64xf32>
    %21 = arith.maximumf %19, %20 : vector<16x64xf32>
    %22 = arith.truncf %21 : vector<16x64xf32> to vector<16x64xbf16>
    %c0_19 = arith.constant 0 : index
    %c0_20 = arith.constant 0 : index
    %23 = vector.load %arg8[%c0_19, %c0_20] : memref<64x1024xbf16, #tpu.memory_space<vmem>>, vector<64x1024xbf16>
    %cst_21 = arith.constant dense<0.000000e+00> : vector<16x1024xf32>
    %24 = tpu.matmul %22, %23, %cst_21 {dimension_numbers = #tpu.dot_dimension_numbers<[1], [0], [0], [1], [0, 0, 1, 1], [], []>} : vector<16x64xbf16>, vector<64x1024xbf16>, vector<16x1024xf32> -> vector<16x1024xf32>
    %c0_22 = arith.constant 0 : index
    %c0_23 = arith.constant 0 : index
    %25 = vector.load %arg9[%c0_22, %c0_23] : memref<1x1024xf32, #tpu.memory_space<vmem>>, vector<1x1024xf32>
    %26 = vector.broadcast %25 : vector<1x1024xf32> to vector<16x1024xf32>
    %27 = arith.addf %24, %26 : vector<16x1024xf32>
    %cst_24 = arith.constant 5.000000e-01 : f32
    %28 = vector.broadcast %cst_24 : f32 to vector<16x1024xf32>
    %29 = arith.mulf %28, %27 : vector<16x1024xf32>
    %30 = math.tanh %29 : vector<16x1024xf32>
    %cst_25 = arith.constant 1.000000e+00 : f32
    %31 = vector.broadcast %cst_25 : f32 to vector<16x1024xf32>
    %32 = arith.addf %30, %31 : vector<16x1024xf32>
    %cst_26 = arith.constant 5.000000e-01 : f32
    %33 = vector.broadcast %cst_26 : f32 to vector<16x1024xf32>
    %34 = arith.mulf %33, %32 : vector<16x1024xf32>
    %c0_27 = arith.constant 0 : index
    %c0_28 = arith.constant 0 : index
    %35 = vector.load %arg10[%c0_27, %c0_28] : memref<16x1024xf32, #tpu.memory_space<vmem>>, vector<16x1024xf32>
    tpu.vector_store %arg10[%c0_27, %c0_28], %34 {strides = array<i32>} : memref<16x1024xf32, #tpu.memory_space<vmem>>, vector<16x1024xf32>,
    return
  }
  func.func @transform_0(%arg0: i32) -> (i32, i32) {
    %c0_i32 = arith.constant 0 : i32
    %c0_i32_0 = arith.constant 0 : i32
    return %arg0, %c0_i32 : i32, i32
  }
  func.func @transform_1(%arg0: i32) -> (i32, i32) {
    %c0_i32 = arith.constant 0 : i32
    %c0_i32_0 = arith.constant 0 : i32
    %c0_i32_1 = arith.constant 0 : i32
    return %c0_i32, %c0_i32_0 : i32, i32
  }
  func.func @transform_2(%arg0: i32) -> (i32, i32) {
    %c0_i32 = arith.constant 0 : i32
    %c0_i32_0 = arith.constant 0 : i32
    %c0_i32_1 = arith.constant 0 : i32
    return %c0_i32, %c0_i32_0 : i32, i32
  }
  func.func @transform_3(%arg0: i32) -> (i32, i32) {
    %c0_i32 = arith.constant 0 : i32
    %c0_i32_0 = arith.constant 0 : i32
    %c0_i32_1 = arith.constant 0 : i32
    return %c0_i32, %c0_i32_0 : i32, i32
  }
  func.func @transform_4(%arg0: i32) -> (i32, i32) {
    %c0_i32 = arith.constant 0 : i32
    %c0_i32_0 = arith.constant 0 : i32
    %c0_i32_1 = arith.constant 0 : i32
    return %c0_i32, %c0_i32_0 : i32, i32
  }
  func.func @transform_5(%arg0: i32) -> (i32, i32) {
    %c0_i32 = arith.constant 0 : i32
    %c0_i32_0 = arith.constant 0 : i32
    %c0_i32_1 = arith.constant 0 : i32
    return %c0_i32, %c0_i32_0 : i32, i32
  }
  func.func @transform_6(%arg0: i32) -> (i32, i32) {
    %c0_i32 = arith.constant 0 : i32
    %c0_i32_0 = arith.constant 0 : i32
    %c0_i32_1 = arith.constant 0 : i32
    return %c0_i32, %c0_i32_0 : i32, i32
  }
  func.func @transform_7(%arg0: i32) -> (i32, i32) {
    %c0_i32 = arith.constant 0 : i32
    %c0_i32_0 = arith.constant 0 : i32
    %c0_i32_1 = arith.constant 0 : i32
    return %c0_i32, %c0_i32_0 : i32, i32
  }
  func.func @transform_8(%arg0: i32) -> (i32, i32) {
    %c0_i32 = arith.constant 0 : i32
    %c0_i32_0 = arith.constant 0 : i32
    %c0_i32_1 = arith.constant 0 : i32
    return %c0_i32, %c0_i32_0 : i32, i32
  }
  func.func @transform_9(%arg0: i32) -> (i32, i32) {
    %c0_i32 = arith.constant 0 : i32
    %c0_i32_0 = arith.constant 0 : i32
    return %arg0, %c0_i32 : i32, i32
  }
  func.func @transform_10(%arg0: i32) -> (i32, i32) {
    %c0_i32 = arith.constant 0 : i32
    %c0_i32_0 = arith.constant 0 : i32
    return %arg0, %c0_i32 : i32, i32
  }
}

</mosaic_0001>

<bundles_post_ra>
// kernel: tpu_custom_call.1
= control target key start
LH: loop header
LB: loop body
LE: loop exit
PB: predicated region body
PF: predicated region fallthrough
CT: control target
= control target key end

     0   :  { %16 = vsyncpa [#allocation3], 0  ;;  %s2344_s0 = inlined_call_operand.vmem [shape: bf16[16,1024], index: 0, kind: input, shape index: {}]   ;;  %s2345_s1 = inlined_call_operand.vmem [shape: bf16[1024,64], index: 1, kind: input, shape index: {}]   ;;  %s2346_s2 = inlined_call_operand.vmem [shape: f32[1,64], index: 2, kind: input, shape index: {}]   ;;  %s2347_s3 = inlined_call_operand.vmem [shape: f32[64,128], index: 3, kind: input, shape index: {}]   ;;  %s2348_s4 = inlined_call_operand.vmem [shape: f32[1,128], index: 4, kind: input, shape index: {}]   ;;  %s2349_s5 = inlined_call_operand.vmem [shape: f32[16,64], index: 5, kind: input, shape index: {}]   ;;  %s2350_s6 = inlined_call_operand.vmem [shape: f32[1,64], index: 6, kind: input, shape index: {}]   ;;  %s2351_s7 = inlined_call_operand.vmem [shape: bf16[64,1024], index: 7, kind: input, shape index: {}]   ;;  %s2352_s8 = inlined_call_operand.vmem [shape: f32[1,1024], index: 8, kind: input, shape index: {}]   ;;  %s2353_s9 = inlined_call_operand.hbm [shape: f32[16,1024], index: 9, kind: output, shape index: {0}]   ;;  %s2354_s10 = inlined_call_operand.hbm [shape: f32[16,128], index: 10, kind: output, shape index: {1}]  }
   0x1   :  { %v1754_v0 = vld [vmem:[%s2345_s1 + $0x40] sm:$0xff]   ;;  %v1758_v4 = vld [vmem:[%s2345_s1 + $0x48] sm:$0xff]   ;;  %v1762_v8 = vld [vmem:[%s2345_s1 + $0x50] sm:$0xff]  }
   0x2   :  { %v1755_v1 = vld [vmem:[%s2345_s1 + $0xc0] sm:$0xff]   ;;  %1599 = vmatprep.subr.bf16.mxu0 %v1754_v0  ;;  %v1759_v5 = vld [vmem:[%s2345_s1 + $0xc8] sm:$0xff]   ;;  %v1763_v9 = vld [vmem:[%s2345_s1 + $0xd0] sm:$0xff]  }
   0x3   :  { %v1756_v2 = vld [vmem:[%s2345_s1] sm:$0xff]   ;;  %1621 = vmatprep.subr.bf16.mxu1 %v1755_v1  ;;  %v1760_v6 = vld [vmem:[%s2345_s1 + $0x8] sm:$0xff]   ;;  %v1764_v10 = vld [vmem:[%s2345_s1 + $0x10] sm:$0xff]  }
   0x4   :  { %v1757_v3 = vld [vmem:[%s2345_s1 + $0x80] sm:$0xff]   ;;  %1600 = vmatpush3.bf16.msra.mxu0 %v1756_v2  ;;  %v1761_v7 = vld [vmem:[%s2345_s1 + $0x88] sm:$0xff]   ;;  %v1765_v11 = vld [vmem:[%s2345_s1 + $0x90] sm:$0xff]  }
   0x5   :  { %1622 = vmatpush3.bf16.msra.mxu1 %v1757_v3  ;;  %1601 = vmatprep.subr.bf16.mxu0 %v1758_v4  ;;  %v1766_v12 = vld [vmem:[%s2345_s1 + $0x58] sm:$0xff]   ;;  %v1770_v16 = vld [vmem:[%s2345_s1 + $0x60] sm:$0xff]   ;;  %v1774_v20 = vld [vmem:[%s2345_s1 + $0x68] sm:$0xff]  }
   0x6   :  { %1623 = vmatprep.subr.bf16.mxu1 %v1759_v5  ;;  %v1767_v13 = vld [vmem:[%s2345_s1 + $0xd8] sm:$0xff]   ;;  %v1771_v17 = vld [vmem:[%s2345_s1 + $0xe0] sm:$0xff]   ;;  %v1775_v21 = vld [vmem:[%s2345_s1 + $0xe8] sm:$0xff]  }
   0x7   :  { %v1768_v14 = vld [vmem:[%s2345_s1 + $0x18] sm:$0xff]   ;;  %v1772_v18 = vld [vmem:[%s2345_s1 + $0x20] sm:$0xff]   ;;  %v1776_v22 = vld [vmem:[%s2345_s1 + $0x28] sm:$0xff]  }
   0x8   :  { %1602 = vmatpush3.bf16.msra.mxu0 %v1760_v6  ;;  %v1769_v15 = vld [vmem:[%s2345_s1 + $0x98] sm:$0xff]   ;;  %v1773_v19 = vld [vmem:[%s2345_s1 + $0xa0] sm:$0xff]   ;;  %v1777_v23 = vld [vmem:[%s2345_s1 + $0xa8] sm:$0xff]  }
   0x9   :  { %1624 = vmatpush3.bf16.msra.mxu1 %v1761_v7  ;;  %1603 = vmatprep.subr.bf16.mxu0 %v1762_v8  ;;  %v1778_v24 = vld [vmem:[%s2345_s1 + $0x70] sm:$0xff]   ;;  %v1782_v28 = vld [vmem:[%s2345_s1 + $0x78] sm:$0xff]   ;;  %v37_v32 = vld [vmem:[%s2344_s0] sm:$0xff] }
   0xa   :  { %1625 = vmatprep.subr.bf16.mxu1 %v1763_v9  ;;  %v1779_v25 = vld [vmem:[%s2345_s1 + $0xf0] sm:$0xff]   ;;  %v1783_v29 = vld [vmem:[%s2345_s1 + $0xf8] sm:$0xff]   ;;  %v41_v33 = vld [vmem:[%s2344_s0 + $0x20] sm:$0xff] }
   0xb   :  { %v1780_v26 = vld [vmem:[%s2345_s1 + $0x30] sm:$0xff]   ;;  %v1784_v30 = vld [vmem:[%s2345_s1 + $0x38] sm:$0xff]   ;;  %v38_v34 = vld [vmem:[%s2344_s0 + $0x8] sm:$0xff]  ;;  %v1485_v35 = vcombine.low %v37_v32, %v41_v33  ;;  %v1486_v36 = vcombine.high %v37_v32, %v41_v33 }
   0xc   :  { %1604 = vmatpush3.bf16.msra.mxu0 %v1764_v10  ;;  %v1781_v27 = vld [vmem:[%s2345_s1 + $0xb0] sm:$0xff]   ;;  %v1785_v31 = vld [vmem:[%s2345_s1 + $0xb8] sm:$0xff]   ;;  %v42_v37 = vld [vmem:[%s2344_s0 + $0x28] sm:$0xff] }
   0xd   :  { %1626 = vmatpush3.bf16.msra.mxu1 %v1765_v11  ;;  %1605 = vmatprep.subr.bf16.mxu0 %v1766_v12  ;;  %v1487_v38 = vcombine.low %v38_v34, %v42_v37  ;;  %v1488_v39 = vcombine.high %v38_v34, %v42_v37  ;;  %v1786_v40 = vld [vmem:[%s2345_s1 + $0x140] sm:$0xff]   ;;  %v1790_v44 = vld [vmem:[%s2345_s1 + $0x148] sm:$0xff]   ;;  %v1794_v48 = vld [vmem:[%s2345_s1 + $0x150] sm:$0xff]  }
   0xe   :  { %1627 = vmatprep.subr.bf16.mxu1 %v1767_v13  ;;  %636 = vmatprep.mubr.bf16.mxu0 %v1486_v36  ;;  %v1787_v41 = vld [vmem:[%s2345_s1 + $0x1c0] sm:$0xff]   ;;  %v1791_v45 = vld [vmem:[%s2345_s1 + $0x1c8] sm:$0xff]   ;;  %v1795_v49 = vld [vmem:[%s2345_s1 + $0x1d0] sm:$0xff]  }
   0xf   :  { %677 = vmatprep.mubr.bf16.mxu1 %v1488_v39  ;;  %v1788_v42 = vld [vmem:[%s2345_s1 + $0x100] sm:$0xff]   ;;  %v1792_v46 = vld [vmem:[%s2345_s1 + $0x108] sm:$0xff]   ;;  %v1796_v50 = vld [vmem:[%s2345_s1 + $0x110] sm:$0xff]  }
  0x10   :  { %1606 = vmatpush3.bf16.msra.mxu0 %v1768_v14  ;;  %v1789_v43 = vld [vmem:[%s2345_s1 + $0x180] sm:$0xff]   ;;  %v1793_v47 = vld [vmem:[%s2345_s1 + $0x188] sm:$0xff]   ;;  %v1797_v51 = vld [vmem:[%s2345_s1 + $0x190] sm:$0xff]  }
  0x11   :  { %1628 = vmatpush3.bf16.msra.mxu1 %v1769_v15  ;;  %1607 = vmatprep.subr.bf16.mxu0 %v1770_v16  ;;  %v1798_v52 = vld [vmem:[%s2345_s1 + $0x158] sm:$0xff]   ;;  %v1802_v56 = vld [vmem:[%s2345_s1 + $0x160] sm:$0xff]   ;;  %v1806_v60 = vld [vmem:[%s2345_s1 + $0x168] sm:$0xff]  }
  0x12   :  { %1629 = vmatprep.subr.bf16.mxu1 %v1771_v17  ;;  %v1799_v53 = vld [vmem:[%s2345_s1 + $0x1d8] sm:$0xff]   ;;  %v1803_v57 = vld [vmem:[%s2345_s1 + $0x1e0] sm:$0xff]   ;;  %v1807_v61 = vld [vmem:[%s2345_s1 + $0x1e8] sm:$0xff]  }
  0x13   :  { %v1800_v54 = vld [vmem:[%s2345_s1 + $0x118] sm:$0xff]   ;;  %v1804_v58 = vld [vmem:[%s2345_s1 + $0x120] sm:$0xff]   ;;  %v1808_v62 = vld [vmem:[%s2345_s1 + $0x128] sm:$0xff]  }
  0x14   :  { %1608 = vmatpush3.bf16.msra.mxu0 %v1772_v18  ;;  %v1801_v55 = vld [vmem:[%s2345_s1 + $0x198] sm:$0xff]   ;;  %v1805_v59 = vld [vmem:[%s2345_s1 + $0x1a0] sm:$0xff]   ;;  %v1809_v63 = vld [vmem:[%s2345_s1 + $0x1a8] sm:$0xff]  }
  0x15   :  { %1630 = vmatpush3.bf16.msra.mxu1 %v1773_v19  ;;  %1609 = vmatprep.subr.bf16.mxu0 %v1774_v20  ;;  %v1810_v0 = vld [vmem:[%s2345_s1 + $0x170] sm:$0xff]   ;;  %v1814_v4 = vld [vmem:[%s2345_s1 + $0x178] sm:$0xff]  }
  0x16   :  { %1631 = vmatprep.subr.bf16.mxu1 %v1775_v21  ;;  %v1811_v1 = vld [vmem:[%s2345_s1 + $0x1f0] sm:$0xff]   ;;  %v1815_v5 = vld [vmem:[%s2345_s1 + $0x1f8] sm:$0xff]  }
  0x17   :  { %v1812_v2 = vld [vmem:[%s2345_s1 + $0x130] sm:$0xff]   ;;  %v1816_v6 = vld [vmem:[%s2345_s1 + $0x138] sm:$0xff]  }
  0x18   :  { %1610 = vmatpush3.bf16.msra.mxu0 %v1776_v22  ;;  %v1813_v3 = vld [vmem:[%s2345_s1 + $0x1b0] sm:$0xff]   ;;  %v1817_v7 = vld [vmem:[%s2345_s1 + $0x1b8] sm:$0xff]  }
  0x19   :  { %1632 = vmatpush3.bf16.msra.mxu1 %v1777_v23  ;;  %1611 = vmatprep.subr.bf16.mxu0 %v1778_v24  ;;  %v39_v8 = vld [vmem:[%s2344_s0 + $0x10] sm:$0xff]  ;;  %v40_v12 = vld [vmem:[%s2344_s0 + $0x18] sm:$0xff] }
  0x1a   :  { %1633 = vmatprep.subr.bf16.mxu1 %v1779_v25  ;;  %v43_v9 = vld [vmem:[%s2344_s0 + $0x30] sm:$0xff]  ;;  %v44_v13 = vld [vmem:[%s2344_s0 + $0x38] sm:$0xff] }
  0x1b   :  { %v1489_v10 = vcombine.low %v39_v8, %v43_v9  ;;  %v1490_v11 = vcombine.high %v39_v8, %v43_v9 }
  0x1c   :  { %1612 = vmatpush3.bf16.msra.mxu0 %v1780_v26 }
  0x1d   :  { %1634 = vmatpush3.bf16.msra.mxu1 %v1781_v27  ;;  %1613 = vmatprep.subr.bf16.mxu0 %v1782_v28 }
  0x1e   :  { %1635 = vmatprep.subr.bf16.mxu1 %v1783_v29 }
  0x20   :  { %1614 = vmatpush3.bf16.msra.mxu0 %v1784_v30 }
  0x21   :  { %1636 = vmatpush3.bf16.msra.mxu1 %v1785_v31  ;;  %1643 = vmatprep.subr.bf16.mxu0 %v1786_v40 }
  0x22   :  { %1665 = vmatprep.subr.bf16.mxu1 %v1787_v41 }
  0x23   :  { %637 = vmatmul.mubr.bf16.vlgmr.msra.gmra.mrb[0].mxu0 %v1485_v35 }
  0x24   :  { %678 = vmatmul.mubr.bf16.vlgmr.msra.gmra.mrb[0].mxu1 %v1487_v38  ;;  %1644 = vmatpush3.bf16.msra.mxu0 %v1788_v42 }
  0x25   :  { %1666 = vmatpush3.bf16.msra.mxu1 %v1789_v43  ;;  %1645 = vmatprep.subr.bf16.mxu0 %v1790_v44 }
  0x26   :  { %1667 = vmatprep.subr.bf16.mxu1 %v1791_v45 }
  0x28   :  { %1646 = vmatpush3.bf16.msra.mxu0 %v1792_v46 }
  0x29   :  { %1668 = vmatpush3.bf16.msra.mxu1 %v1793_v47  ;;  %1647 = vmatprep.subr.bf16.mxu0 %v1794_v48 }
  0x2a   :  { %1669 = vmatprep.subr.bf16.mxu1 %v1795_v49 }
  0x2c   :  { %1648 = vmatpush3.bf16.msra.mxu0 %v1796_v50 }
  0x2d   :  { %1670 = vmatpush3.bf16.msra.mxu1 %v1797_v51  ;;  %1649 = vmatprep.subr.bf16.mxu0 %v1798_v52 }
  0x2e   :  { %1671 = vmatprep.subr.bf16.mxu1 %v1799_v53 }
  0x30   :  { %1650 = vmatpush3.bf16.msra.mxu0 %v1800_v54 }
  0x31   :  { %1672 = vmatpush3.bf16.msra.mxu1 %v1801_v55  ;;  %1651 = vmatprep.subr.bf16.mxu0 %v1802_v56 }
  0x32   :  { %1673 = vmatprep.subr.bf16.mxu1 %v1803_v57 }
  0x34   :  { %1652 = vmatpush3.bf16.msra.mxu0 %v1804_v58 }
  0x35   :  { %1674 = vmatpush3.bf16.msra.mxu1 %v1805_v59  ;;  %1653 = vmatprep.subr.bf16.mxu0 %v1806_v60 }
  0x36   :  { %1675 = vmatprep.subr.bf16.mxu1 %v1807_v61 }
  0x38   :  { %1654 = vmatpush3.bf16.msra.mxu0 %v1808_v62 }
  0x39   :  { %1676 = vmatpush3.bf16.msra.mxu1 %v1809_v63  ;;  %1655 = vmatprep.subr.bf16.mxu0 %v1810_v0 }
  0x3a   :  { %1677 = vmatprep.subr.bf16.mxu1 %v1811_v1 }
  0x3c   :  { %1656 = vmatpush3.bf16.msra.mxu0 %v1812_v2 }
  0x3d   :  { %1678 = vmatpush3.bf16.msra.mxu1 %v1813_v3  ;;  %1657 = vmatprep.subr.bf16.mxu0 %v1814_v4 }
  0x3e   :  { %1679 = vmatprep.subr.bf16.mxu1 %v1815_v5 }
  0x40   :  { %1658 = vmatpush3.bf16.msra.mxu0 %v1816_v6 }
  0x41   :  { %17 = vsyncpa [#allocation5], 0  ;;  %1680 = vmatpush3.bf16.msra.mxu1 %v1817_v7  ;;  %v1491_v14 = vcombine.low %v40_v12, %v44_v13  ;;  %v1492_v15 = vcombine.high %v40_v12, %v44_v13  ;;  %718 = vmatprep.mubr.bf16.mxu0 %v1490_v11  ;;  %v770_v16 = vld [vmem:[%s2347_s3] sm:$0xff]  ;;  %v771_v17 = vld [vmem:[%s2347_s3 + $0x8] sm:$0xff]  ;;  %vm785_vm0 = vcmask 523264   ;;  %vm878_vm1 = vcmask 130048  }
  0x42   :  { %v1727_v18 = vpack.c.bf16 %v771_v17, %v770_v16  ;;  %v772_v19 = vld [vmem:[%s2347_s3 + $0x10] sm:$0xff]  ;;  %v773_v20 = vld [vmem:[%s2347_s3 + $0x18] sm:$0xff]  ;;  %v774_v22 = vld [vmem:[%s2347_s3 + $0x20] sm:$0xff] }
  0x43   :  { %759 = vmatprep.mubr.bf16.mxu1 %v1492_v15  ;;  %719 = vmatmul.mubr.bf16.vlgmr.msra.gmra.mrb[4].mxu0 %v1489_v10  ;;  %v1731_v21 = vpack.c.bf16 %v773_v20, %v772_v19  ;;  %v775_v23 = vld [vmem:[%s2347_s3 + $0x28] sm:$0xff]  ;;  %v776_v25 = vld [vmem:[%s2347_s3 + $0x30] sm:$0xff]  ;;  %v777_v26 = vld [vmem:[%s2347_s3 + $0x38] sm:$0xff] }
  0x44   :  { %760 = vmatmul.mubr.bf16.vlgmr.msra.gmra.mrb[4].mxu1 %v1491_v14  ;;  %1728 = vmatprep.subr.bf16.mxu0 %v1727_v18  ;;  %v1735_v24 = vpack.c.bf16 %v775_v23, %v774_v22  ;;  %v1739_v27 = vpack.c.bf16 %v777_v26, %v776_v25  ;;  %v869_v28 = vld [vmem:[%s2349_s5] sm:$0xff]  ;;  %v870_v29 = vld [vmem:[%s2349_s5 + $0x8] sm:$0xff] }
  0x45   :  { %1730 = vmatpush3.bf16.msra.mxu0 %v1727_v18  ;;  %v1743_v30 = vpack.c.bf16 %v870_v29, %v869_v28  ;;  %v1484_v33 = vld [vmem:[%s2346_s2] ss:$0 sm:$0xff]  ;;  %v964_v4 = vld [vmem:[%s2351_s7 + $0x8] sm:$0xff] }
  0x46   :  { %1732 = vmatprep.subr.bf16.mxu0 %v1731_v21  ;;  %v963_v2 = vld [vmem:[%s2351_s7] sm:$0xff]  ;;  %v968_v7 = vld [vmem:[%s2351_s7 + $0x28] sm:$0xff] }
  0x47   :  { %1744 = vmatprep.subr.bf16.mxu1 %v1743_v30  ;;  %v967_v3 = vld [vmem:[%s2351_s7 + $0x20] sm:$0xff]  ;;  %v1565_v8 = vcombine.low %v964_v4, %v968_v7  ;;  %v1566_v9 = vcombine.high %v964_v4, %v968_v7  ;;  %v972_v10 = vld [vmem:[%s2351_s7 + $0x48] sm:$0xff]  ;;  %v993_v7 = vld [vmem:[%s2351_s7 + $0xf0] sm:$0xff] }
  0x48   :  { %1746 = vmatpush3.bf16.msra.mxu1 %v1743_v30  ;;  %v1563_v5 = vcombine.low %v963_v2, %v967_v3  ;;  %v1564_v6 = vcombine.high %v963_v2, %v967_v3  ;;  %v976_v11 = vld [vmem:[%s2351_s7 + $0x68] sm:$0xff]  ;;  %v1557_v18 = vld [vmem:[%s2348_s4] ss:$0 sm:$0xff] }
  0x49   :  { %1734 = vmatpush3.bf16.msra.mxu0 %v1731_v21  ;;  %v1574_v12 = vcombine.high %v972_v10, %v976_v11  ;;  %v1573_v13 = vcombine.low %v972_v10, %v976_v11  ;;  %v980_v14 = vld [vmem:[%s2351_s7 + $0x88] sm:$0xff]  ;;  %v971_v20 = vld [vmem:[%s2351_s7 + $0x40] sm:$0xff] }
  0x4a   :  { %1736 = vmatprep.subr.bf16.mxu0 %v1735_v24  ;;  %1200 = vmatprep.subr.bf16.mxu1 %v1564_v6  ;;  %v984_v15 = vld [vmem:[%s2351_s7 + $0xa8] sm:$0xff]  ;;  %v975_v21 = vld [vmem:[%s2351_s7 + $0x60] sm:$0xff]  ;;  %v989_v6 = vld [vmem:[%s2351_s7 + $0xd0] sm:$0xff] }
  0x4b   :  { %v1582_v16 = vcombine.high %v980_v14, %v984_v15  ;;  %v1581_v17 = vcombine.low %v980_v14, %v984_v15  ;;  %v1572_v25 = vcombine.high %v971_v20, %v975_v21  ;;  %v979_v26 = vld [vmem:[%s2351_s7 + $0x80] sm:$0xff]  ;;  %v1571_v28 = vcombine.low %v971_v20, %v975_v21 }
  0x4c   :  { %v1591_v14 = vcombine.low %v989_v6, %v993_v7 }
  0x4d   :  { %1738 = vmatpush3.bf16.msra.mxu0 %v1735_v24 }
  0x4e   :  { %1740 = vmatprep.subr.bf16.mxu0 %v1739_v27 }
  0x51   :  { %1742 = vmatpush3.bf16.msra.mxu0 %v1739_v27  ;;  %v983_v27 = vld [vmem:[%s2351_s7 + $0xa0] sm:$0xff] }
  0x52   :  { %1243 = vmatprep.subr.bf16.mxu0 %v1566_v9  ;;  %v1580_v29 = vcombine.high %v979_v26, %v983_v27  ;;  %v1579_v30 = vcombine.low %v979_v26, %v983_v27  ;;  %v994_v9 = vld [vmem:[%s2351_s7 + $0xf8] sm:$0xff] }
  0xf6   :  { %v1615_v31 = vpop.f32.mrb[0].mxu0 }
  0xf7   :  { %v1637_v32 = vpop.f32.mrb[0].mxu1  ;;  %v1616_v34 = vpop.f32.mrb[1].mxu0 }
  0xf8   :  { %v1617_v35 = vadd.f32 %v1616_v34, %v1615_v31  ;;  %v1638_v36 = vpop.f32.mrb[1].mxu1  ;;  %v1618_v37 = vpop.f32.mrb[2].mxu0  ;;  %v987_v31 = vld [vmem:[%s2351_s7 + $0xc0] sm:$0xff] }
  0xf9   :  { %v1639_v38 = vadd.f32 %v1638_v36, %v1637_v32  ;;  %v1640_v39 = vpop.f32.mrb[2].mxu1  ;;  %v1619_v40 = vpop.f32.mrb[3].mxu0  ;;  %v991_v32 = vld [vmem:[%s2351_s7 + $0xe0] sm:$0xff] }
  0xfa   :  { %v639_v41 = vadd.f32 %v1617_v35, %v1484_v33  ;;  %v1620_v42 = vadd.f32 %v1619_v40, %v1618_v37  ;;  %v1641_v43 = vpop.f32.mrb[3].mxu1  ;;  %v1588_v34 = vcombine.high %v987_v31, %v991_v32  ;;  %v992_v35 = vld [vmem:[%s2351_s7 + $0xe8] sm:$0xff]  ;;  %v1587_v36 = vcombine.low %v987_v31, %v991_v32  ;;  %v969_v40 = vld [vmem:[%s2351_s7 + $0x30] sm:$0xff] }
  0xfb   :  { %v1642_v44 = vadd.f32 %v1641_v43, %v1640_v39  ;;  %v965_v39 = vld [vmem:[%s2351_s7 + $0x10] sm:$0xff] }
  0xfc   :  { %v680_v45 = vadd.f32 %v1639_v38, %v639_v41  ;;  %v642_v46 = vadd.f32 %v1620_v42, %v1484_v33  ;;  %v988_v33 = vld [vmem:[%s2351_s7 + $0xc8] sm:$0xff]  ;;  %v966_v41 = vld [vmem:[%s2351_s7 + $0x18] sm:$0xff]  ;;  %v1567_v42 = vcombine.low %v965_v39, %v969_v40  ;;  %v1568_v43 = vcombine.high %v965_v39, %v969_v40 }
  0xfd   :  { %v1589_v37 = vcombine.low %v988_v33, %v992_v35  ;;  %v1590_v38 = vcombine.high %v988_v33, %v992_v35 }
  0xfe   :  { %v683_v47 = vadd.f32 %v1642_v44, %v642_v46  ;;  %v970_v44 = vld [vmem:[%s2351_s7 + $0x38] sm:$0xff] }
  0xff   :  { %v1569_v46 = vcombine.low %v966_v41, %v970_v44 }
 0x116   :  { %v1659_v48 = vpop.f32.mrb[4].mxu0 }
 0x117   :  { %v1681_v49 = vpop.f32.mrb[4].mxu1  ;;  %v1660_v50 = vpop.f32.mrb[5].mxu0 }
 0x118   :  { %v1661_v51 = vadd.f32 %v1660_v50, %v1659_v48  ;;  %v1682_v52 = vpop.f32.mrb[5].mxu1  ;;  %v1662_v53 = vpop.f32.mrb[6].mxu0  ;;  %v1560_v48 = vld [vmem:[%s2350_s6] ss:$0 sm:$0xff] }
 0x119   :  { %v1683_v54 = vadd.f32 %v1682_v52, %v1681_v49  ;;  %v1684_v55 = vpop.f32.mrb[6].mxu1  ;;  %v1663_v56 = vpop.f32.mrb[7].mxu0 }
 0x11a   :  { %v721_v57 = vadd.f32 %v1661_v51, %v680_v45  ;;  %v1664_v58 = vadd.f32 %v1663_v56, %v1662_v53  ;;  %v1685_v59 = vpop.f32.mrb[7].mxu1  ;;  %v1898_v45 = vmov 0   ;;  %v973_v53 = vld [vmem:[%s2351_s7 + $0x50] sm:$0xff]  ;;  %v974_v56 = vld [vmem:[%s2351_s7 + $0x58] sm:$0xff] }
 0x11b   :  { %v1686_v60 = vadd.f32 %v1685_v59, %v1684_v55  ;;  %v977_v55 = vld [vmem:[%s2351_s7 + $0x70] sm:$0xff] }
 0x11c   :  { %v762_v61 = vadd.f32 %v1683_v54, %v721_v57  ;;  %v724_v62 = vadd.f32 %v1664_v58, %v683_v47  ;;  %v1570_v47 = vcombine.high %v966_v41, %v970_v44  ;;  %v978_v57 = vld [vmem:[%s2351_s7 + $0x78] sm:$0xff]  ;;  %v1575_v2 = vcombine.low %v973_v53, %v977_v55 }
 0x11d   :  { %v1577_v3 = vcombine.low %v974_v56, %v978_v57 }
 0x11e   :  { %v768_v63 = vmax.f32 %v762_v61, 0.0  ;;  %v765_v0 = vadd.f32 %v1686_v60, %v724_v62  ;;  %v1576_v60 = vcombine.high %v973_v53, %v977_v55  ;;  %v1578_v61 = vcombine.high %v974_v56, %v978_v57  ;;  %v981_v62 = vld [vmem:[%s2351_s7 + $0x90] sm:$0xff] }
 0x120   :  { %v769_v1 = vmax.f32 %v765_v0, 0.0  ;;  %1717 = vmatprep.mubr.msk.f32.mxu0 %vm785_vm0, %v768_v63  ;;  %v985_v63 = vld [vmem:[%s2351_s7 + $0xb0] sm:$0xff]  ;;  %v982_v0 = vld [vmem:[%s2351_s7 + $0x98] sm:$0xff] }
 0x121   :  { %v1584_v4 = vcombine.high %v981_v62, %v985_v63  ;;  %v1583_v10 = vcombine.low %v981_v62, %v985_v63 }
 0x122   :  { %1718 = vmatmul.mubr.msk.f32.vlgmr.msra.gmra.mrb[8].mxu0 %vm785_vm0, %v769_v1  ;;  %v986_v1 = vld [vmem:[%s2351_s7 + $0xb8] sm:$0xff] }
 0x123   :  { %1244 = vmatpush1.bf16.msra.mxu0 %v1565_v8  ;;  %1275 = vmatprep.mubr.bf16.mxu0 %v1898_v45  ;;  %v990_v8 = vld [vmem:[%s2351_s7 + $0xd8] sm:$0xff]  ;;  %v1585_v11 = vcombine.low %v982_v0, %v986_v1  ;;  %s1899_s7 = smov [#allocation4]  }
 0x124   :  { %1245 = vmatprep.subr.bf16.mxu0 %v1574_v12  ;;  %v1592_v12 = vcombine.high %v989_v6, %v993_v7  ;;  %v1593_v15 = vcombine.low %v990_v8, %v994_v9  ;;  %s1469_s27 = sshll.u32 %s1899_s7, 4  ;;  %s1470_s27 = int_to_ptr.vmem [resolvable:$true] %s1469_s27 }
 0x125   :  { %s1850_s28 = scalar_lea.vmem %s1470_s27, 256  ;;  %p1855_p1 = scmp.lt.s32.totalorder %s1470_s27, %s1470_s27 }
 0x126   :  { %p1851_p0 = scmp.ne.s32.totalorder %s1470_s27, %s1850_s28  ;;  %p1856_p2 = scmp.lt.s32.totalorder %s1850_s28, %s1850_s28 }
 0x127   :  { %1246 = vmatpush1.bf16.msra.mxu0 %v1573_v13  ;;  %v1594_v13 = vcombine.high %v990_v8, %v994_v9 }
 0x128   :  { %1247 = vmatprep.subr.bf16.mxu0 %v1582_v16  ;;  %p1857_p3 = por %p1856_p2, %p1855_p1 }
 0x12a   :  { %p1858_p4 = pnand %p1857_p3, %p1851_p0 }
 0x12b   :  { %1248 = vmatpush1.bf16.msra.mxu0 %v1581_v17 }
 0x12c   :  { %1249 = vmatprep.subr.bf16.mxu0 %v1590_v38 }
 0x12f   :  { %1250 = vmatpush1.bf16.msra.mxu0 %v1589_v37 }
 0x130   :  { %1329 = vmatprep.subr.bf16.mxu0 %v1570_v47 }
 0x1f5   :  { %v1719_v19 = vpop.f32.mrb[8].mxu0 }
 0x1f6   :  { %v864_v22 = vadd.f32 %v1719_v19, %v1557_v18  ;;  %v858_v23 = vpop.f32.mrb[9].mxu0 }
 0x1f7   :  { %v859_v24 = vadd.f32 %v1557_v18, %v858_v23 }
 0x1f8   :  { %868 = vst [vmem:[#allocation4 + $0x8] sm:$0xff] %v864_v22 }
 0x1f9   :  { %867 = vst [vmem:[#allocation4] sm:$0xff] %v859_v24  ;;  %1724 = vmatprep.mubr.msk.f32.mxu1 %vm878_vm1, %v859_v24 }
 0x1fa   :  { %1725 = vmatmul.mubr.msk.f32.vlgmr.msra.gmra.mrb[8].mxu1 %vm878_vm1, %v864_v22 }
 0x1fb   :  { %1201 = vmatpush1.bf16.msra.mxu1 %v1563_v5  ;;  %1232 = vmatprep.mubr.bf16.mxu1 %v1898_v45  ;;  %v1586_v5 = vcombine.high %v982_v0, %v986_v1 }
 0x1fc   :  { %1202 = vmatprep.subr.bf16.mxu1 %v1572_v25 }
 0x1ff   :  { %1203 = vmatpush1.bf16.msra.mxu1 %v1571_v28 }
 0x200   :  { %1204 = vmatprep.subr.bf16.mxu1 %v1580_v29 }
 0x203   :  { %1205 = vmatpush1.bf16.msra.mxu1 %v1579_v30 }
 0x204   :  { %1206 = vmatprep.subr.bf16.mxu1 %v1588_v34 }
 0x207   :  { %1207 = vmatpush1.bf16.msra.mxu1 %v1587_v36 }
 0x208   :  { %1286 = vmatprep.subr.bf16.mxu1 %v1568_v43 }
 0x2cd   :  { %v1726_v49 = vpop.f32.mrb[8].mxu1 }
 0x2ce   :  { %v957_v50 = vadd.f32 %v1726_v49, %v1560_v48  ;;  %v951_v51 = vpop.f32.mrb[9].mxu1 }
 0x2cf   :  { %v952_v52 = vadd.f32 %v1560_v48, %v951_v51 }
 0x2d0   :  { %v961_v54 = vmax.f32 %v957_v50, 0.0 }
 0x2d1   :  { %v960_v58 = vmax.f32 %v952_v52, 0.0 }
 0x2d3   :  { %v962_v59 = vpack.c.bf16 %v961_v54, %v960_v58 }
 0x2d5   :  { %1595 = vmatmul.mubr.msk.bf16.vlgmr.msra.gmra.mrb[12].mxu1 %vm785_vm0, %v962_v59  ;;  %1596 = vmatmul.mubr.msk.bf16.vlgmr.msra.gmra.mrb[12].mxu0 %vm785_vm0, %v962_v59 }
 0x2d6   :  { %1287 = vmatpush1.bf16.msra.mxu1 %v1567_v42  ;;  %1330 = vmatpush1.bf16.msra.mxu0 %v1569_v46 }
 0x2d7   :  { %1288 = vmatprep.subr.bf16.mxu1 %v1576_v60  ;;  %1331 = vmatprep.subr.bf16.mxu0 %v1578_v61 }
 0x2d8   :  { %1318 = vmatprep.mubr.bf16.mxu1 %v1898_v45  ;;  %1361 = vmatprep.mubr.bf16.mxu0 %v1898_v45 }
 0x2da   :  { %1289 = vmatpush1.bf16.msra.mxu1 %v1575_v2  ;;  %1332 = vmatpush1.bf16.msra.mxu0 %v1577_v3 }
 0x2db   :  { %1290 = vmatprep.subr.bf16.mxu1 %v1584_v4  ;;  %1333 = vmatprep.subr.bf16.mxu0 %v1586_v5 }
 0x2de   :  { %1291 = vmatpush1.bf16.msra.mxu1 %v1583_v10  ;;  %1334 = vmatpush1.bf16.msra.mxu0 %v1585_v11 }
 0x2df   :  { %1292 = vmatprep.subr.bf16.mxu1 %v1592_v12  ;;  %1335 = vmatprep.subr.bf16.mxu0 %v1594_v13 }
 0x2e2   :  { %1293 = vmatpush1.bf16.msra.mxu1 %v1591_v14  ;;  %1336 = vmatpush1.bf16.msra.mxu0 %v1593_v15 }
 0x2e5   :  { %1597 = vmatmul.mubr.msk.bf16.vlgmr.msra.gmra.mrb[16].mxu1 %vm785_vm0, %v962_v59  ;;  %1598 = vmatmul.mubr.msk.bf16.vlgmr.msra.gmra.mrb[16].mxu0 %vm785_vm0, %v962_v59 }
 0x2e6   :  { %1861 = shalt.err (!%p1858_p4)
}
 0x2e7   :  { %s1862_s11 = scalar_lea.hbm %s2354_s10, 256 }
 0x2e8   :  { %p1863_p5 = scmp.ne.s32.totalorder %s2354_s10, %s1862_s11  ;;  %p1866_p6 = scmp.lt.u32.totalorder %s1862_s11, %s2354_s10 }
 0x2ea   :  { %p1868_p7 = pnand %p1866_p6, %p1863_p5 }
 0x2ec   :  { %1871 = shalt.err (!%p1868_p7)
}
 0x2ed   :  { %s1900_s4 = smov 128   ;;  %s1901_s16 = smov 8   ;;  %v997_v16 = vlaneseq  ;;  %v995_v20 = vld [vmem:[%s2352_s8] sm:$0xff] }
 0x2ee   :  { %1475 = dma.vmem_to_hbm [thread:$0]  %s1470_s27, 256, %s2354_s10, [#allocation5], %s1900_s4, %s1900_s4, %s1901_s16  }
 0x2ef   :  { %v998_v17 = vshrl.u32 %v997_v16, 7  ;;  %s1902_s8 = smov [#allocation2]  }
 0x2f0   :  { %s1457_s10 = sshll.u32 %s1902_s8, 4  ;;  %s1458_s10 = int_to_ptr.vmem [resolvable:$true] %s1457_s10 }
 0x2f1   :  { %v999_v18 = vsub.s32 0, %v998_v17  ;;  %v1007_v19 = vsub.s32 2, %v998_v17  ;;  %v1003_v21 = vsub.s32 1, %v998_v17  ;;  %v1011_v22 = vsub.s32 3, %v998_v17  ;;  %s1872_s1 = scalar_lea.vmem %s1458_s10, 2048  ;;  %p1877_p9 = scmp.lt.s32.totalorder %s1458_s10, %s1458_s10 }
 0x2f2   :  { %v1015_v51 = vsub.s32 4, %v998_v17  ;;  %v1023_v52 = vsub.s32 6, %v998_v17  ;;  %v1019_v53 = vsub.s32 5, %v998_v17  ;;  %v1027_v54 = vsub.s32 7, %v998_v17  ;;  %p1873_p8 = scmp.ne.s32.totalorder %s1458_s10, %s1872_s1  ;;  %p1878_p10 = scmp.lt.s32.totalorder %s1872_s1, %s1872_s1 }
 0x2f3   :  { %v1000_v23 = vrot.slane %v995_v20, %v999_v18  ;;  %v1008_v24 = vrot.slane %v995_v20, %v1007_v19  ;;  %v1004_v25 = vrot.slane %v995_v20, %v1003_v21  ;;  %v1012_v26 = vrot.slane %v995_v20, %v1011_v22 }
 0x2f4   :  { %v1016_v55 = vrot.slane %v995_v20, %v1015_v51  ;;  %v1024_v56 = vrot.slane %v995_v20, %v1023_v52  ;;  %v1020_v57 = vrot.slane %v995_v20, %v1019_v53  ;;  %v1028_v58 = vrot.slane %v995_v20, %v1027_v54  ;;  %p1879_p11 = por %p1878_p10, %p1877_p9 }
 0x2f6   :  { %p1880_p12 = pnand %p1879_p11, %p1873_p8 }
 0x3a8   :  { %v1234_v27 = vpop.f32.mrb[12].mxu1  ;;  %v1277_v28 = vpop.f32.mrb[12].mxu0 }
 0x3a9   :  { %v1235_v29 = vadd.f32 %v1234_v27, %v1000_v23  ;;  %v1278_v30 = vadd.f32 %v1277_v28, %v1008_v24  ;;  %v1236_v31 = vpop.f32.mrb[13].mxu1  ;;  %v1279_v32 = vpop.f32.mrb[13].mxu0 }
 0x3aa   :  { %v1237_v33 = vadd.f32 %v1236_v31, %v1004_v25  ;;  %v1280_v34 = vadd.f32 %v1279_v32, %v1012_v26  ;;  %v1238_v35 = vpop.f32.mrb[14].mxu1  ;;  %v1281_v36 = vpop.f32.mrb[14].mxu0 }
 0x3ab   :  { %v1372_v37 = vmul.f32 0.5, %v1235_v29  ;;  %v1374_v38 = vmul.f32 0.5, %v1278_v30  ;;  %v1239_v39 = vadd.f32 %v1238_v35, %v1000_v23  ;;  %v1282_v40 = vadd.f32 %v1281_v36, %v1008_v24  ;;  %v1240_v41 = vpop.f32.mrb[15].mxu1  ;;  %v1283_v42 = vpop.f32.mrb[15].mxu0 }
 0x3ac   :  { %v1373_v43 = vmul.f32 0.5, %v1237_v33  ;;  %v1375_v44 = vmul.f32 0.5, %v1280_v34  ;;  %v1241_v45 = vadd.f32 %v1240_v41, %v1004_v25  ;;  %v1284_v46 = vadd.f32 %v1283_v42, %v1012_v26 }
 0x3ad   :  { %1818 = vtanh.f32 %v1372_v37  ;;  %v1380_v47 = vmul.f32 0.5, %v1239_v39  ;;  %v1382_v48 = vmul.f32 0.5, %v1282_v40 }
 0x3ae   :  { %1820 = vtanh.f32 %v1374_v38  ;;  %v1381_v49 = vmul.f32 0.5, %v1241_v45  ;;  %v1383_v50 = vmul.f32 0.5, %v1284_v46 }
 0x3af   :  { %1822 = vtanh.f32 %v1373_v43 }
 0x3b0   :  { %1824 = vtanh.f32 %v1375_v44 }
 0x3b1   :  { %1826 = vtanh.f32 %v1380_v47 }
 0x3b2   :  { %1828 = vtanh.f32 %v1382_v48 }
 0x3b3   :  { %1830 = vtanh.f32 %v1381_v49 }
 0x3b4   :  { %1832 = vtanh.f32 %v1383_v50 }
 0x3b7   :  { %v1819_v59 = vpop.eup %1818 }
 0x3b8   :  { %v1821_v60 = vpop.eup %1820  ;;  %v1404_v61 = vadd.f32 1.0, %v1819_v59  ;;  %v1320_v62 = vpop.f32.mrb[16].mxu1 }
 0x3b9   :  { %v1363_v63 = vpop.f32.mrb[16].mxu0  ;;  %v1823_v0 = vpop.eup %1822  ;;  %v1406_v1 = vadd.f32 1.0, %v1821_v60  ;;  %v1321_v2 = vadd.f32 %v1320_v62, %v1016_v55 }
 0x3ba   :  { %v1364_v3 = vadd.f32 %v1363_v63, %v1024_v56  ;;  %v1322_v4 = vpop.f32.mrb[17].mxu1  ;;  %v1365_v5 = vpop.f32.mrb[17].mxu0  ;;  %v1420_v7 = vmul.f32 0.5, %v1404_v61  ;;  %v1405_v8 = vadd.f32 1.0, %v1823_v0 }
 0x3bb   :  { %v1825_v6 = vpop.eup %1824  ;;  %v1323_v9 = vadd.f32 %v1322_v4, %v1020_v57  ;;  %v1366_v10 = vadd.f32 %v1365_v5, %v1028_v58  ;;  %v1324_v11 = vpop.f32.mrb[18].mxu1  ;;  %v1422_v14 = vmul.f32 0.5, %v1406_v1  ;;  %v1376_v16 = vmul.f32 0.5, %v1321_v2 }
 0x3bc   :  { %v1367_v12 = vpop.f32.mrb[18].mxu0  ;;  %v1827_v13 = vpop.eup %1826  ;;  %v1407_v15 = vadd.f32 1.0, %v1825_v6  ;;  %v1378_v17 = vmul.f32 0.5, %v1364_v3  ;;  %1436 = vst [vmem:[#allocation2] sm:$0xff] %v1420_v7  ;;  %v1421_v21 = vmul.f32 0.5, %v1405_v8  ;;  %v1325_v28 = vadd.f32 %v1324_v11, %v1016_v55 }
 0x3bd   :  { %v1326_v18 = vpop.f32.mrb[19].mxu1  ;;  %v1369_v19 = vpop.f32.mrb[19].mxu0  ;;  %v1412_v22 = vadd.f32 1.0, %v1827_v13  ;;  %v1377_v23 = vmul.f32 0.5, %v1323_v9  ;;  %v1379_v24 = vmul.f32 0.5, %v1366_v10  ;;  %1438 = vst [vmem:[#allocation2 + $0x10] sm:$0xff] %v1422_v14  ;;  %1834 = vtanh.f32 %v1376_v16 }
 0x3be   :  { %v1829_v20 = vpop.eup %1828  ;;  %v1423_v26 = vmul.f32 0.5, %v1407_v15  ;;  %1437 = vst [vmem:[#allocation2 + $0x8] sm:$0xff] %v1421_v21  ;;  %1836 = vtanh.f32 %v1378_v17  ;;  %v1368_v32 = vadd.f32 %v1367_v12, %v1024_v56  ;;  %v1384_v35 = vmul.f32 0.5, %v1325_v28 }
 0x3bf   :  { %v1831_v25 = vpop.eup %1830  ;;  %v1414_v27 = vadd.f32 1.0, %v1829_v20  ;;  %v1428_v30 = vmul.f32 0.5, %v1412_v22  ;;  %1838 = vtanh.f32 %v1377_v23  ;;  %v1327_v38 = vadd.f32 %v1326_v18, %v1020_v57 }
 0x3c0   :  { %v1833_v29 = vpop.eup %1832  ;;  %v1413_v31 = vadd.f32 1.0, %v1831_v25  ;;  %1439 = vst [vmem:[#allocation2 + $0x18] sm:$0xff] %v1423_v26  ;;  %1840 = vtanh.f32 %v1379_v24  ;;  %v1386_v37 = vmul.f32 0.5, %v1368_v32  ;;  %v1370_v40 = vadd.f32 %v1369_v19, %v1028_v58 }
 0x3c1   :  { %v1430_v33 = vmul.f32 0.5, %v1414_v27  ;;  %v1415_v34 = vadd.f32 1.0, %v1833_v29  ;;  %1444 = vst [vmem:[#allocation2 + $0x40] sm:$0xff] %v1428_v30  ;;  %1842 = vtanh.f32 %v1384_v35  ;;  %v1385_v41 = vmul.f32 0.5, %v1327_v38 }
 0x3c2   :  { %v1429_v36 = vmul.f32 0.5, %v1413_v31  ;;  %1844 = vtanh.f32 %v1386_v37  ;;  %v1387_v42 = vmul.f32 0.5, %v1370_v40 }
 0x3c3   :  { %1446 = vst [vmem:[#allocation2 + $0x50] sm:$0xff] %v1430_v33  ;;  %v1431_v39 = vmul.f32 0.5, %v1415_v34  ;;  %1846 = vtanh.f32 %v1385_v41 }
 0x3c4   :  { %1445 = vst [vmem:[#allocation2 + $0x48] sm:$0xff] %v1429_v36  ;;  %1848 = vtanh.f32 %v1387_v42 }
 0x3c5   :  { %1447 = vst [vmem:[#allocation2 + $0x58] sm:$0xff] %v1431_v39 }
 0x3c7   :  { %v1835_v43 = vpop.eup %1834 }
 0x3c8   :  { %v1837_v44 = vpop.eup %1836  ;;  %v1408_v45 = vadd.f32 1.0, %v1835_v43 }
 0x3c9   :  { %v1839_v46 = vpop.eup %1838  ;;  %v1410_v47 = vadd.f32 1.0, %v1837_v44 }
 0x3ca   :  { %v1841_v48 = vpop.eup %1840  ;;  %v1424_v49 = vmul.f32 0.5, %v1408_v45  ;;  %v1409_v50 = vadd.f32 1.0, %v1839_v46 }
 0x3cb   :  { %v1843_v51 = vpop.eup %1842  ;;  %v1426_v52 = vmul.f32 0.5, %v1410_v47  ;;  %v1411_v53 = vadd.f32 1.0, %v1841_v48 }
 0x3cc   :  { %v1845_v54 = vpop.eup %1844  ;;  %1440 = vst [vmem:[#allocation2 + $0x20] sm:$0xff] %v1424_v49  ;;  %v1425_v55 = vmul.f32 0.5, %v1409_v50  ;;  %v1416_v56 = vadd.f32 1.0, %v1843_v51 }
 0x3cd   :  { %1442 = vst [vmem:[#allocation2 + $0x30] sm:$0xff] %v1426_v52  ;;  %v1427_v57 = vmul.f32 0.5, %v1411_v53  ;;  %v1418_v58 = vadd.f32 1.0, %v1845_v54  ;;  %v1847_v59 = vpop.eup %1846 }
 0x3ce   :  { %1441 = vst [vmem:[#allocation2 + $0x28] sm:$0xff] %v1425_v55  ;;  %v1432_v60 = vmul.f32 0.5, %v1416_v56  ;;  %v1849_v61 = vpop.eup %1848  ;;  %v1417_v63 = vadd.f32 1.0, %v1847_v59 }
 0x3cf   :  { %1443 = vst [vmem:[#allocation2 + $0x38] sm:$0xff] %v1427_v57  ;;  %v1434_v62 = vmul.f32 0.5, %v1418_v58  ;;  %v1419_v0 = vadd.f32 1.0, %v1849_v61 }
 0x3d0   :  { %1448 = vst [vmem:[#allocation2 + $0x60] sm:$0xff] %v1432_v60  ;;  %v1433_v1 = vmul.f32 0.5, %v1417_v63 }
 0x3d1   :  { %1450 = vst [vmem:[#allocation2 + $0x70] sm:$0xff] %v1434_v62  ;;  %v1435_v2 = vmul.f32 0.5, %v1419_v0 }
 0x3d2   :  { %1449 = vst [vmem:[#allocation2 + $0x68] sm:$0xff] %v1433_v1 }
 0x3d3   :  { %1451 = vst [vmem:[#allocation2 + $0x78] sm:$0xff] %v1435_v2 }
 0x3d4   :  { %1883 = shalt.err (!%p1880_p12)
}
 0x3d5   :  { %s1884_s19 = scalar_lea.hbm %s2353_s9, 2048 }
 0x3d6   :  { %p1885_p13 = scmp.ne.s32.totalorder %s2353_s9, %s1884_s19  ;;  %p1888_p0 = scmp.lt.u32.totalorder %s1884_s19, %s2353_s9 }
 0x3d8   :  { %p1890_p1 = pnand %p1888_p0, %p1885_p13 }
 0x3da   :  { %1893 = shalt.err (!%p1890_p1)
}
 0x3db   :  { %s1903_s23 = smov 1024   ;;  %s1904_s24 = smov 64  }
 0x3dc   :  { %1463 = dma.vmem_to_hbm [thread:$0]  %s1458_s10, 2048, %s2353_s9, [#allocation3], %s1903_s23, %s1903_s23, %s1904_s24  }
 0x3dd   :  { %1894 = dma.done.wait [#allocation3], 2048  }
 0x3de   :  { %1895 = vsyncadd [#allocation3], 4294965248 }
 0x3df   :  { %1896 = dma.done.wait [#allocation5], 256  }
 0x3e0   :  { %1897 = vsyncadd [#allocation5], 4294967040 }
 0x3e1   :  { %1482 = vsyncpa [#allocation3], 1 }
 0x3e2   :  { %1483 = vsyncpa [#allocation5], 1 }

</bundles_post_ra>
